<compile_context>
chip_gen: v7x
topology: tpu7x:2x2x1
jax: 0.10.0
libtpu: 0.0.40
codegen_flags: <defaults>
</compile_context>

<pallas_src>
import jax
import jax.numpy as jnp
from jax.experimental import pallas as pl
from jax.experimental.pallas import tpu as pltpu


def _zero_model_kernel(dummy_ref, out_ref):
    # dummy_ref: SMEM (1,) scalar ; out_ref: VMEM (1, batch*out_size), lane-dense.
    # One scalar multiply keeps `dummy * zeros` NaN/Inf-propagation semantics;
    # the write is a single splat store.
    zero_val = dummy_ref[0] * jnp.float32(0.0)
    out_ref[...] = jnp.broadcast_to(zero_val, out_ref.shape)


def zero_model_forward(x, carry, dummy_param, out_size):
    """Pallas implementation of ZeroModel.forward / sequential_eval."""
    batch = x.shape[0]
    flat = batch * out_size

    out_flat = pl.pallas_call(
        _zero_model_kernel,
        out_shape=jax.ShapeDtypeStruct((1, flat), jnp.float32),
        in_specs=[pl.BlockSpec(memory_space=pltpu.SMEM)],
        # Full-array block (block_shape == array shape) satisfies tiling rules
        # for these tiny, non-(8,128)-aligned dims; the flat (1, batch*out_size)
        # layout keeps every live element in the lane dimension (single vreg,
        # one unmasked-as-possible splat store).
        out_specs=pl.BlockSpec(
            (1, flat), lambda: (0, 0), memory_space=pltpu.VMEM
        ),
    )(dummy_param)

    # Restore the PyTorch output layout (batch, 1, out_size) in the wrapper —
    # a zero-cost metadata reshape for XLA.
    out = out_flat.reshape(batch, 1, out_size)

    # carry is returned unchanged (pure pass-through, no compute needed).
    return out, carry


class ZeroModelPallas:
    """Mirror of the PyTorch ZeroModel (parameters initialized in-script)."""

    def __init__(self, in_size, hidden_size, out_size, layers):
        # DeepLearnableModel.__init__ params (unused by forward, kept for parity)
        self.mean = jnp.ones((in_size,), jnp.float32)
        self.std = jnp.ones((in_size,), jnp.float32)
        self.out_size = out_size
        # dummy_param = torch.tensor(1.0) ; kept as a (1,) array for SMEM passing.
        self.dummy_param = jnp.ones((1,), jnp.float32)

    def __call__(self, x, carry):
        return zero_model_forward(x, carry, self.dummy_param, self.out_size)


if __name__ == "__main__":
    key = jax.random.PRNGKey(0)
    kx, kc = jax.random.split(key)

    batch, seq, in_size = 2, 8, 4
    hidden_size, out_size, layers = 32, 6, 2

    x = jax.random.normal(kx, (batch, seq, in_size), dtype=jnp.float32)
    carry = jax.random.normal(kc, (batch, hidden_size), dtype=jnp.float32)

    model = ZeroModelPallas(in_size, hidden_size, out_size, layers)
    out, carry_out = model(x, carry)
    out = jax.block_until_ready(out)
    carry_out = jax.block_until_ready(carry_out)

    assert out.shape == (batch, 1, out_size), out.shape
    assert out.dtype == jnp.float32, out.dtype
    assert bool(jnp.all(out == 0.0)), "output must be all zeros"
    assert bool(jnp.all(carry_out == carry)), "carry must pass through unchanged"

    print("KERNEL_OK")
</pallas_src>

<mosaic_0001>
module attributes {stable_mosaic.version = 11 : i64} {
  func.func @_zero_model_kernel(%arg0: memref<1xf32, #tpu.memory_space<smem>>, %arg1: memref<1x12xf32, #tpu.memory_space<vmem>>) attributes {dimension_semantics = [], scalar_prefetch = 0 : i64, scratch_operands = 0 : i64, tpu.core_type = #tpu.core_type<tc>} {
    %c0 = arith.constant 0 : index
    %0 = memref.load %arg0[%c0] : memref<1xf32, #tpu.memory_space<smem>>
    %cst = arith.constant 0.000000e+00 : f32
    %1 = arith.mulf %0, %cst : f32
    %2 = vector.broadcast %1 : f32 to vector<1x12xf32>
    %c0_0 = arith.constant 0 : index
    %c0_1 = arith.constant 0 : index
    %3 = vector.load %arg1[%c0_0, %c0_1] : memref<1x12xf32, #tpu.memory_space<vmem>>, vector<1x12xf32>
    tpu.vector_store %arg1[%c0_0, %c0_1], %2 {strides = array<i32>} : memref<1x12xf32, #tpu.memory_space<vmem>>, vector<1x12xf32>,
    return
  }
}

</mosaic_0001>

<bundles_post_ra>
// kernel: tpu_custom_call.1
= control target key start
LH: loop header
LB: loop body
LE: loop exit
PB: predicated region body
PF: predicated region fallthrough
CT: control target
= control target key end

     0   :  { %vm13_vm0 = vcmask 90112   ;;  %s80_s0 = inlined_call_operand.<no memory space> [shape: f32[1], index: 0, kind: input, shape index: {}]   ;;  %s81_s1 = inlined_call_operand.hbm [shape: f32[1,12], index: 1, kind: output, shape index: {}]  }
   0x1   :  { %s11_s8 = smul.f32 0.0, %s80_s0 }
   0x2   :  { %7 = vsyncpa [#allocation4], 0  ;;  %s54_s9 = smov [#allocation3]  }
   0x3   :  { %s21_s10 = sshll.u32 %s54_s9, 4  ;;  %v12_v0 = vstv %s11_s8  ;;  %s22_s10 = int_to_ptr.vmem [resolvable:$true] %s21_s10 }
   0x4   :  { %14 = vst.msk [vmem:[#allocation3] sm:$0x1] %vm13_vm0, %v12_v0  ;;  %s30_s11 = scalar_lea.vmem %s22_s10, 16  ;;  %s34_s12 = scalar_lea.vmem %s22_s10, 32 }
   0x5   :  { %p31_p0 = scmp.ne.s32.totalorder %s22_s10, %s30_s11  ;;  %p35_p1 = scmp.lt.s32.totalorder %s22_s10, %s22_s10 }
   0x6   :  { %p36_p2 = scmp.lt.s32.totalorder %s34_s12, %s30_s11 }
   0x8   :  { %p37_p3 = por %p36_p2, %p35_p1 }
   0xa   :  { %p38_p4 = pnand %p37_p3, %p31_p0 }
   0xc   :  { %41 = shalt.err (!%p38_p4)
}
   0xd   :  { %s42_s15 = scalar_lea.hbm %s81_s1, 16 }
   0xe   :  { %p43_p5 = scmp.ne.s32.totalorder %s81_s1, %s42_s15  ;;  %p46_p6 = scmp.lt.u32.totalorder %s42_s15, %s81_s1 }
  0x10   :  { %p48_p7 = pnand %p46_p6, %p43_p5 }
  0x12   :  { %51 = shalt.err (!%p48_p7)
}
  0x13   :  { %24 = dma.vmem_to_hbm [thread:$0]  %s22_s10, 16, %s81_s1, [#allocation4]  }
  0x14   :  { %52 = dma.done.wait [#allocation4], 16  }
  0x15   :  { %53 = vsyncadd [#allocation4], 4294967280 }
  0x16   :  { %28 = vsyncpa [#allocation4], 1 }

</bundles_post_ra>
